<compile_context>
chip_gen: v6e
topology: v6e:2x2x1
jax: 0.10.0
libtpu: 0.0.40
codegen_flags: <defaults>
</compile_context>

<pallas_src>
import functools

import jax
import jax.numpy as jnp
from jax.experimental import pallas as pl
from jax.experimental.pallas import tpu as pltpu


_LANE = 128   # TPU lane width; x / output tiles are kept lane-dense.
_HALO = 128   # right halo block = one lane tile; requires K - 1 <= 128.


def _round_up(v, m):
    return ((v + m - 1) // m) * m


def conv_bn_act_kernel(x_ref, halo_ref, w_ref, bias_ref, o_ref, *, K, TL, relu, tanh):
    """One (batch, time-tile) grid step of fused Conv1d + folded BN + activation.

    x_ref:    (1, C_in, TL)     bf16  current time tile of the pre-padded input
    halo_ref: (1, C_in, 128)    bf16  next 128 columns (right conv halo)
    w_ref:    (K, C_out, C_in)  bf16  conv weights with BN scale folded in, tap-major
    bias_ref: (C_out, 1)        f32   folded bias = (conv_b - mean) * scale + beta
    o_ref:    (1, C_out, TL)    f32
    """
    c_out = w_ref.shape[1]
    # (C_in, TL + 128) working slab; TL + 128 is a multiple of 128 -> clean lane layout.
    slab = jnp.concatenate([x_ref[0], halo_ref[0]], axis=-1)
    acc = jnp.zeros((c_out, TL), jnp.float32)
    # K is small and static -> unrolled into K bf16 MXU matmuls with f32 accumulation.
    for k in range(K):
        acc += jnp.dot(w_ref[k], slab[:, k:k + TL],
                       preferred_element_type=jnp.float32)
    y = acc + bias_ref[...]          # BN scale already folded into the weights.
    if relu:
        y = jnp.maximum(y, 0.0)
    if tanh:
        y = jnp.tanh(y)
    # TODO(synk): Dropout(p=0.5) is identity in eval mode; stochastic training mask not implemented.
    o_ref[0] = y.astype(o_ref.dtype)


@functools.partial(jax.jit, static_argnames=("nonlinear", "tl", "vmem_limit_bytes"))
def conv_bn_block(x, weight, conv_bias, gamma, beta, running_mean, running_var,
                  nonlinear="relu", eps=1e-5, tl=512, vmem_limit_bytes=None):
    """x: (N, C_in, L) f32 -> (N, C_out, L) f32  (ConvBNBlock inference forward)."""
    N, C_in, L = x.shape
    C_out, C_in_w, K = weight.shape
    assert C_in_w == C_in
    # PyTorch module asserts (kernel_size - 1) % 2 == 0; 'same' output length only holds for odd K.
    assert (K - 1) % 2 == 0, "ConvBNBlock requires an odd kernel_size"
    assert K - 1 <= _HALO, "kernel_size too large for the 128-column halo block"
    P = (K - 1) // 2

    # Lane-aligned time tile (multiple of 128).  For v7x (64 MiB VMEM) keep tl such that
    # 2x (x tile + out tile) + weights stays well under the limit; v5e/v6e can use larger tl
    # (and a raised vmem_limit_bytes) to amortize per-grid-step overhead.
    TL = _round_up(min(tl, _round_up(L, _LANE)), _LANE)
    T = pl.cdiv(L, TL)
    L_pad = T * TL

    # Fold BN running stats + affine + conv bias:
    #   y = (conv(x) + b - mean) * s + beta,   s = gamma / sqrt(var + eps)
    # s is per-output-channel -> fold into the conv weights; only the bias add remains in-kernel.
    scale = gamma / jnp.sqrt(running_var + eps)                        # (C_out,)
    w_k = jnp.transpose(weight * scale[:, None, None], (2, 0, 1))      # (K, C_out, C_in)
    w_k = w_k.astype(jnp.bfloat16)
    bias2 = ((conv_bias - running_mean) * scale + beta).astype(jnp.float32).reshape(C_out, 1)

    # Zero-pad the time axis: P columns of conv halo on the left, then out to L_pad + 128 on the
    # right so every (tile, halo) block pair is in range.  bf16 halves x DMA bytes and feeds the
    # MXU directly.  (The pad is fused into this jit region together with the pallas_call.)
    x_pad = jnp.pad(x.astype(jnp.bfloat16),
                    ((0, 0), (0, 0), (P, L_pad + _HALO - P - L)))

    relu = nonlinear == "relu"
    tanh = nonlinear == "tanh"
    kernel = functools.partial(conv_bn_act_kernel, K=K, TL=TL, relu=relu, tanh=tanh)

    halo_step = TL // _HALO
    flops = 2 * N * C_out * C_in * K * L_pad
    bytes_accessed = (N * T * (TL + _HALO) * C_in * 2      # x tiles + halos (bf16)
                      + K * C_out * C_in * 2               # weights (bf16)
                      + C_out * 4                          # bias (f32)
                      + N * C_out * L_pad * 4)             # output (f32)
    cost = pl.CostEstimate(flops=flops,
                           transcendentals=(N * C_out * L_pad if tanh else 0),
                           bytes_accessed=bytes_accessed)

    out = pl.pallas_call(
        kernel,
        out_shape=jax.ShapeDtypeStruct((N, C_out, L_pad), jnp.float32),
        grid=(N, T),
        in_specs=[
            pl.BlockSpec((1, C_in, TL), lambda n, t: (n, 0, t)),                       # x tile
            pl.BlockSpec((1, C_in, _HALO), lambda n, t: (n, 0, (t + 1) * halo_step)),  # right halo
            pl.BlockSpec((K, C_out, C_in), lambda n, t: (0, 0, 0)),                    # weights
            pl.BlockSpec((C_out, 1), lambda n, t: (0, 0)),                             # bias
        ],
        out_specs=pl.BlockSpec((1, C_out, TL), lambda n, t: (n, 0, t)),
        compiler_params=pltpu.CompilerParams(
            dimension_semantics=("parallel", "parallel"),
            vmem_limit_bytes=vmem_limit_bytes,
        ),
        cost_estimate=cost,
    )(x_pad, x_pad, w_k, bias2)

    return out[:, :, :L]


def _reference(x, weight, conv_bias, gamma, beta, running_mean, running_var,
               nonlinear="relu", eps=1e-5):
    P = (weight.shape[-1] - 1) // 2
    y = jax.lax.conv_general_dilated(
        x, weight, window_strides=(1,), padding=[(P, P)],
        dimension_numbers=("NCH", "OIH", "NCH"),
    ) + conv_bias.reshape(1, -1, 1)
    y = (y - running_mean.reshape(1, -1, 1)) / jnp.sqrt(
        running_var.reshape(1, -1, 1) + eps
    ) * gamma.reshape(1, -1, 1) + beta.reshape(1, -1, 1)
    if nonlinear == "relu":
        y = jnp.maximum(y, 0.0)
    elif nonlinear == "tanh":
        y = jnp.tanh(y)
    return y


if __name__ == "__main__":
    # Small shapes consistent with ConvBNBlock(in_channels=4, out_channels=8, kernel_size=5,
    # nonlinear='relu') applied to a (batch=2, channels=4, seq=16) input.
    N, C_in, C_out, L, K = 2, 4, 8, 16, 5

    key = jax.random.PRNGKey(0)
    kx, kw, kb, kg, kbe, km, kv = jax.random.split(key, 7)

    x = jax.random.normal(kx, (N, C_in, L), jnp.float32)
    weight = jax.random.normal(kw, (C_out, C_in, K), jnp.float32) * 0.1
    conv_bias = jax.random.normal(kb, (C_out,), jnp.float32) * 0.1
    gamma = 1.0 + 0.1 * jax.random.normal(kg, (C_out,), jnp.float32)
    beta = 0.1 * jax.random.normal(kbe, (C_out,), jnp.float32)
    running_mean = 0.1 * jax.random.normal(km, (C_out,), jnp.float32)
    running_var = 1.0 + 0.1 * jax.nn.softplus(jax.random.normal(kv, (C_out,), jnp.float32))

    out = conv_bn_block(x, weight, conv_bias, gamma, beta, running_mean, running_var,
                        nonlinear="relu")
    out = jax.block_until_ready(out)

    ref = _reference(x, weight, conv_bias, gamma, beta, running_mean, running_var,
                     nonlinear="relu")
    assert out.shape == (N, C_out, L)
    # bf16 MXU inputs (with f32 accumulation) vs an all-f32 reference -> loosened tolerance.
    assert jnp.allclose(out, ref, atol=2e-2, rtol=2e-2), "mismatch vs JAX reference"

    print("KERNEL_OK")
</pallas_src>

<mosaic_0001>
module attributes {stable_mosaic.version = 11 : i64} {
  func.func @conv_bn_act_kernel(%arg0: i32, %arg1: i32, %arg2: memref<1x4x128xbf16, #tpu.memory_space<vmem>>, %arg3: memref<1x4x128xbf16, #tpu.memory_space<vmem>>, %arg4: memref<5x8x4xbf16, #tpu.memory_space<vmem>>, %arg5: memref<8x1xf32, #tpu.memory_space<vmem>>, %arg6: memref<1x8x128xf32, #tpu.memory_space<vmem>>) attributes {dimension_semantics = [#tpu.dimension_semantics<parallel>, #tpu.dimension_semantics<parallel>], iteration_bounds = array<i64: 2, 1>, scalar_prefetch = 0 : i64, scratch_operands = 0 : i64, tpu.core_type = #tpu.core_type<tc>, window_params = [{transform_indices = @transform_0, window_bounds = array<i64: 1, 4, 128>}, {transform_indices = @transform_1, window_bounds = array<i64: 1, 4, 128>}, {pipeline_mode = #tpu.pipeline_mode<synchronous>, transform_indices = @transform_2, window_bounds = array<i64: 5, 8, 4>}, {pipeline_mode = #tpu.pipeline_mode<synchronous>, transform_indices = @transform_3, window_bounds = array<i64: 8, 1>}, {transform_indices = @transform_4, window_bounds = array<i64: 1, 8, 128>}]} {
    %c0 = arith.constant 0 : index
    %c0_0 = arith.constant 0 : index
    %c0_1 = arith.constant 0 : index
    %0 = vector.load %arg2[%c0, %c0_0, %c0_1] : memref<1x4x128xbf16, #tpu.memory_space<vmem>>, vector<1x4x128xbf16>
    %1 = vector.shape_cast %0 : vector<1x4x128xbf16> to vector<4x128xbf16>
    %c0_2 = arith.constant 0 : index
    %c0_3 = arith.constant 0 : index
    %c0_4 = arith.constant 0 : index
    %2 = vector.load %arg3[%c0_2, %c0_3, %c0_4] : memref<1x4x128xbf16, #tpu.memory_space<vmem>>, vector<1x4x128xbf16>
    %3 = vector.shape_cast %2 : vector<1x4x128xbf16> to vector<4x128xbf16>
    %4 = tpu.concatenate %1, %3 in 1 : vector<4x128xbf16>, vector<4x128xbf16> -> vector<4x256xbf16>
    %cst = arith.constant 0.000000e+00 : f32
    %5 = vector.broadcast %cst : f32 to vector<8x128xf32>
    %c0_5 = arith.constant 0 : index
    %c0_6 = arith.constant 0 : index
    %c0_7 = arith.constant 0 : index
    %6 = vector.load %arg4[%c0_5, %c0_6, %c0_7] : memref<5x8x4xbf16, #tpu.memory_space<vmem>>, vector<1x8x4xbf16>
    %7 = vector.shape_cast %6 : vector<1x8x4xbf16> to vector<8x4xbf16>
    %8 = vector.extract_strided_slice %4 {offsets = [0, 0], sizes = [4, 128], strides = [1, 1]} : vector<4x256xbf16> to vector<4x128xbf16>
    %cst_8 = arith.constant dense<0.000000e+00> : vector<8x128xf32>
    %9 = tpu.matmul %7, %8, %cst_8 {dimension_numbers = #tpu.dot_dimension_numbers<[1], [0], [0], [1], [0, 0, 1, 1], [], []>} : vector<8x4xbf16>, vector<4x128xbf16>, vector<8x128xf32> -> vector<8x128xf32>
    %10 = arith.addf %5, %9 : vector<8x128xf32>
    %c1 = arith.constant 1 : index
    %c0_9 = arith.constant 0 : index
    %c0_10 = arith.constant 0 : index
    %11 = vector.load %arg4[%c1, %c0_9, %c0_10] : memref<5x8x4xbf16, #tpu.memory_space<vmem>>, vector<1x8x4xbf16>
    %12 = vector.shape_cast %11 : vector<1x8x4xbf16> to vector<8x4xbf16>
    %13 = vector.extract_strided_slice %4 {offsets = [0, 1], sizes = [4, 128], strides = [1, 1]} : vector<4x256xbf16> to vector<4x128xbf16>
    %cst_11 = arith.constant dense<0.000000e+00> : vector<8x128xf32>
    %14 = tpu.matmul %12, %13, %cst_11 {dimension_numbers = #tpu.dot_dimension_numbers<[1], [0], [0], [1], [0, 0, 1, 1], [], []>} : vector<8x4xbf16>, vector<4x128xbf16>, vector<8x128xf32> -> vector<8x128xf32>
    %15 = arith.addf %10, %14 : vector<8x128xf32>
    %c2 = arith.constant 2 : index
    %c0_12 = arith.constant 0 : index
    %c0_13 = arith.constant 0 : index
    %16 = vector.load %arg4[%c2, %c0_12, %c0_13] : memref<5x8x4xbf16, #tpu.memory_space<vmem>>, vector<1x8x4xbf16>
    %17 = vector.shape_cast %16 : vector<1x8x4xbf16> to vector<8x4xbf16>
    %18 = vector.extract_strided_slice %4 {offsets = [0, 2], sizes = [4, 128], strides = [1, 1]} : vector<4x256xbf16> to vector<4x128xbf16>
    %cst_14 = arith.constant dense<0.000000e+00> : vector<8x128xf32>
    %19 = tpu.matmul %17, %18, %cst_14 {dimension_numbers = #tpu.dot_dimension_numbers<[1], [0], [0], [1], [0, 0, 1, 1], [], []>} : vector<8x4xbf16>, vector<4x128xbf16>, vector<8x128xf32> -> vector<8x128xf32>
    %20 = arith.addf %15, %19 : vector<8x128xf32>
    %c3 = arith.constant 3 : index
    %c0_15 = arith.constant 0 : index
    %c0_16 = arith.constant 0 : index
    %21 = vector.load %arg4[%c3, %c0_15, %c0_16] : memref<5x8x4xbf16, #tpu.memory_space<vmem>>, vector<1x8x4xbf16>
    %22 = vector.shape_cast %21 : vector<1x8x4xbf16> to vector<8x4xbf16>
    %23 = vector.extract_strided_slice %4 {offsets = [0, 3], sizes = [4, 128], strides = [1, 1]} : vector<4x256xbf16> to vector<4x128xbf16>
    %cst_17 = arith.constant dense<0.000000e+00> : vector<8x128xf32>
    %24 = tpu.matmul %22, %23, %cst_17 {dimension_numbers = #tpu.dot_dimension_numbers<[1], [0], [0], [1], [0, 0, 1, 1], [], []>} : vector<8x4xbf16>, vector<4x128xbf16>, vector<8x128xf32> -> vector<8x128xf32>
    %25 = arith.addf %20, %24 : vector<8x128xf32>
    %c4 = arith.constant 4 : index
    %c0_18 = arith.constant 0 : index
    %c0_19 = arith.constant 0 : index
    %26 = vector.load %arg4[%c4, %c0_18, %c0_19] : memref<5x8x4xbf16, #tpu.memory_space<vmem>>, vector<1x8x4xbf16>
    %27 = vector.shape_cast %26 : vector<1x8x4xbf16> to vector<8x4xbf16>
    %28 = vector.extract_strided_slice %4 {offsets = [0, 4], sizes = [4, 128], strides = [1, 1]} : vector<4x256xbf16> to vector<4x128xbf16>
    %cst_20 = arith.constant dense<0.000000e+00> : vector<8x128xf32>
    %29 = tpu.matmul %27, %28, %cst_20 {dimension_numbers = #tpu.dot_dimension_numbers<[1], [0], [0], [1], [0, 0, 1, 1], [], []>} : vector<8x4xbf16>, vector<4x128xbf16>, vector<8x128xf32> -> vector<8x128xf32>
    %30 = arith.addf %25, %29 : vector<8x128xf32>
    %c0_21 = arith.constant 0 : index
    %c0_22 = arith.constant 0 : index
    %31 = vector.load %arg5[%c0_21, %c0_22] : memref<8x1xf32, #tpu.memory_space<vmem>>, vector<8x1xf32>
    %32 = vector.broadcast %31 : vector<8x1xf32> to vector<8x128xf32>
    %33 = arith.addf %30, %32 : vector<8x128xf32>
    %cst_23 = arith.constant 0.000000e+00 : f32
    %34 = vector.broadcast %cst_23 : f32 to vector<8x128xf32>
    %35 = arith.maximumf %33, %34 : vector<8x128xf32>
    %c0_24 = arith.constant 0 : index
    %c0_25 = arith.constant 0 : index
    %c0_26 = arith.constant 0 : index
    %36 = vector.load %arg6[%c0_24, %c0_25, %c0_26] : memref<1x8x128xf32, #tpu.memory_space<vmem>>, vector<1x8x128xf32>
    %37 = vector.shape_cast %36 : vector<1x8x128xf32> to vector<8x128xf32>
    %38 = vector.shape_cast %35 : vector<8x128xf32> to vector<1x8x128xf32>
    tpu.vector_store %arg6[%c0_24, %c0_25, %c0_26], %38 {strides = array<i32>} : memref<1x8x128xf32, #tpu.memory_space<vmem>>, vector<1x8x128xf32>,
    return
  }
  func.func @transform_0(%arg0: i32, %arg1: i32) -> (i32, i32, i32) {
    %c0_i32 = arith.constant 0 : i32
    %c0_i32_0 = arith.constant 0 : i32
    return %arg0, %c0_i32, %arg1 : i32, i32, i32
  }
  func.func @transform_1(%arg0: i32, %arg1: i32) -> (i32, i32, i32) {
    %c1_i32 = arith.constant 1 : i32
    %0 = arith.addi %arg1, %c1_i32 : i32
    %c1_i32_0 = arith.constant 1 : i32
    %1 = arith.muli %0, %c1_i32_0 : i32
    %c0_i32 = arith.constant 0 : i32
    %c0_i32_1 = arith.constant 0 : i32
    return %arg0, %c0_i32, %1 : i32, i32, i32
  }
  func.func @transform_2(%arg0: i32, %arg1: i32) -> (i32, i32, i32) {
    %c0_i32 = arith.constant 0 : i32
    %c0_i32_0 = arith.constant 0 : i32
    %c0_i32_1 = arith.constant 0 : i32
    %c0_i32_2 = arith.constant 0 : i32
    return %c0_i32, %c0_i32_0, %c0_i32_1 : i32, i32, i32
  }
  func.func @transform_3(%arg0: i32, %arg1: i32) -> (i32, i32) {
    %c0_i32 = arith.constant 0 : i32
    %c0_i32_0 = arith.constant 0 : i32
    %c0_i32_1 = arith.constant 0 : i32
    return %c0_i32, %c0_i32_0 : i32, i32
  }
  func.func @transform_4(%arg0: i32, %arg1: i32) -> (i32, i32, i32) {
    %c0_i32 = arith.constant 0 : i32
    %c0_i32_0 = arith.constant 0 : i32
    return %arg0, %c0_i32, %arg1 : i32, i32, i32
  }
}

</mosaic_0001>

<bundles_post_ra>
// kernel: conv_bn_block.1
= control target key start
LH: loop header
LB: loop body
LE: loop exit
PB: predicated region body
PF: predicated region fallthrough
CT: control target
= control target key end

     0   :  { %9 = vsyncpa [#allocation3], 0  ;;  %s1040_s0 = inlined_call_operand.vmem [shape: bf16[2,4,256], index: 0, kind: input, shape index: {}, may-alias: {0,1}]   ;;  %s1041_s1 = inlined_call_operand.vmem [shape: bf16[2,4,256], index: 1, kind: input, shape index: {}, may-alias: {0,1}]   ;;  %s1042_s2 = inlined_call_operand.vmem [shape: bf16[5,8,4], index: 2, kind: input, shape index: {}]   ;;  %s1043_s3 = inlined_call_operand.vmem [shape: f32[8,1], index: 3, kind: input, shape index: {}]   ;;  %s1044_s4 = inlined_call_operand.hbm [shape: f32[2,8,128], index: 4, kind: output, shape index: {}]  }
   0x1   :  { %11 = vsyncpa [#allocation3 + $0x1], 0  ;;  %s889_s15 = smov 0   ;;  %s891_s16 = smov 0  }
   0x2   :  { %s893_s17 = smov 0   ;;  %s895_s18 = smov 0  }
   0x3   :  { %s897_s19 = smov 0   ;;  %s899_s20 = smov 0  }
   0x4 LB: > { %s648_s21 = sadd.s32 4294967295, %s854_s20   ;;  %s649_s22 = sadd.s32 4294967294, %s854_s20   ;;  %s854_s20 = sphi %s899_s20, %s17_s20   ;;  %s850_s19 = sphi %s897_s19, %s1051_s19   ;;  %s846_s18 = sphi %s895_s18, %s1050_s18   ;;  %s842_s17 = sphi %s893_s17, %s1049_s17   ;;  %s838_s16 = sphi %s891_s16, %s1048_s16   ;;  %s834_s15 = sphi %s889_s15, %s1047_s15  }
   0x5   : > { %s29_s23 = sadd.s32 1, %s850_s19  ;;  %s138_s24 = sadd.s32 1, %s842_s17 }
   0x6   : > { %p31_p0 = scmp.ge.s32.totalorder %s29_s23, 2  ;;  %p148_p1 = scmp.ne.s32.totalorder %s842_s17, %s838_s16 }
   0x7   : > { %p149_p2 = scmp.eq.s32.totalorder %s648_s21, 1  ;;  %p154_p3 = scmp.ne.s32.totalorder %s838_s16, %s834_s15 }
   0x8   : > { %s1053_s23 = smov (%p31_p0, %s29_s23), 0  ;;  %p155_p5 = scmp.eq.s32.totalorder %s649_s22, 1 }
   0x9   : > { %p929_p4 = por %p149_p2, %p148_p1  ;;  %s133_s26 = ssub.s32 %s850_s19, %s1053_s23 }
   0xa   : > { %p652_p6 = scmp.ge.s32.totalorder %s854_s20, 1  ;;  %p136_p7 = scmp.eq.s32.totalorder %s133_s26, 0 }
   0xb   : > { %p936_p8 = por %p155_p5, %p154_p3  ;;  %p203_p9 = scmp.lt.s32.totalorder %s854_s20, 3 }
   0xc   : > { %s942_s28 = scalar_select %p136_p7, %s842_s17, %s138_s24  }
   0xd   : > { %p204_p10 = pnand %p652_p6, %p203_p9 }
   0xe   : > { %p241_p11 = scmp.lt.s32.totalorder (!%p204_p10), %s846_s18, 1  ;;  %s858_s12 = smov (!%p204_p10), 126  }
   0xf   : > { %207 = sbr.rel (%p204_p10) target bundleno = 377 (0x179), region = 36  ;;  %s859_s13 = smov (!%p204_p10), 127  }
  0x10   : > { %s860_s22 = smov (!%p204_p10), 125   ;;  %s861_s24 = smov (!%p204_p10), 124  }
  0x11   : > { %s668_s14 = sshll.u32 (!%p204_p10), %s846_s18, 7 }
  0x14   : > { %v856_v0 = vmov 0.0   ;;  %s242_s29 = scalar_select %p241_p11, %s846_s18, 1  ;;  %vm857_vm0 = vmmov 0   ;;  %vm277_vm1 = vcmask 1041408   ;;  %vm273_vm2 = vcmask 31744   ;;  %v532_v6 = vld [vmem:[%s1043_s3] sm:$0xff] }
  0x15   : > { %685 = vmatprep.subr.bf16.mxu0 %v856_v0  ;;  %691 = vmatprep.subr.bf16.mxu1 %v856_v0  ;;  %v262_v4 = vld [vmem:[%s1042_s2] sm:$0xf]  ;;  %v862_v5 = vmov 0   ;;  %vm373_vm3 = vcmask 1031168   ;;  %vm271_vm4 = vcmask 1039360   ;;  %vm428_vm5 = vcmask 1022976  }
  0x16   : > { %687 = vmatprep.mubr.msk.bf16.mxu0 %vm857_vm0, %v856_v0  ;;  %693 = vmatprep.mubr.msk.bf16.mxu1 %vm857_vm0, %v856_v0  ;;  %s671_s30 = sshll.u32 %s242_s29, 2  ;;  %v658_v14 = vld [vmem:[%s1042_s2 + $0x4] sm:$0xf]  ;;  %vm483_vm6 = vcmask 1014784   ;;  %v663_v20 = vld [vmem:[%s1042_s2 + $0xc] sm:$0xf]  ;;  %s1000_s29 = scalar_lea.hbm %s1044_s4, %s668_s14 }
  0x17   : > { %s248_s7 = scalar_lea.vmem %s1040_s0, %s671_s30  ;;  %s673_s8 = sadd.s32 2, %s671_s30  ;;  %777 = vset.pattern.permute.xlu0 %v862_v5  ;;  %v661_v24 = vld [vmem:[%s1042_s2 + $0x8] sm:$0xf]  ;;  %v665_v26 = vld [vmem:[%s1042_s2 + $0x10] sm:$0xf] }
  0x18   : > { %v260_v1 = vld [vmem:[%s248_s7] sm:$0x3]  ;;  %s257_s11 = scalar_lea.vmem %s1041_s1, %s673_s8  ;;  %s863_s18 = smov [#allocation2]  }
  0x19   : > { %369 = vrot.lane.b32.xlu1 %v260_v1, %s858_s12  ;;  %267 = vrot.lane.b32.xlu0 %v260_v1, %s859_s13  ;;  %v325_v2 = vsel %vm277_vm1, %v260_v1, 0  ;;  %v261_v3 = vld [vmem:[%s257_s11] sm:$0x3]  ;;  %s782_s6 = sshll.u32 %s863_s18, 4  ;;  %s783_s6 = int_to_ptr.vmem [resolvable:$false] %s782_s6 }
  0x1a   : > { %692 = vmatpush3.bf16.msra.mxu1 %v325_v2  ;;  %s784_s7 = scalar_lea.vmem %s783_s6, 256 }
  0x1b   : > { %703 = vmatprep.subr.bf16.mxu1 %v856_v0 }
  0x1d   : > { %371 = vrot.lane.b32.xlu1 %v261_v3, %s858_s12  ;;  %269 = vrot.lane.b32.xlu0 %v261_v3, %s859_s13  ;;  %s238_s12 = sand.u32 1, %s838_s16  }
  0x1e   : > { %694 = vmatmul.mubr.msk.bf16.vlgmr.msra.gmra.mxu1 %vm273_vm2, %v262_v4  ;;  %s653_s13 = sshll.u32 %s238_s12, 3  ;;  %s542_s30 = scalar_lea.sflag [#allocation3], %s238_s12 }
  0x1f   : > { %705 = vmatprep.mubr.msk.bf16.mxu1 %vm857_vm0, %v856_v0  ;;  %s240_s21 = scalar_lea.vmem [#allocation2], %s653_s13 }
  0x21   : > { %426 = vrot.lane.b32.xlu1 %v261_v3, %s860_s22  ;;  %424 = vrot.lane.b32.xlu0 %v260_v1, %s860_s22  ;;  %s556_s22 = sshll.u32 %s240_s21, 4  ;;  %s557_s22 = int_to_ptr.vmem [resolvable:$true] %s556_s22 }
  0x22   : > { %s778_s5 = scalar_lea.vmem %s557_s22, 128  ;;  %p785_p1 = scmp.lt.s32.totalorder %s557_s22, %s783_s6 }
  0x23   : > { %p779_p12 = scmp.ne.s32.totalorder %s557_s22, %s778_s5  ;;  %p786_p2 = scmp.lt.s32.totalorder %s784_s7, %s778_s5 }
  0x25   : > { %481 = vrot.lane.b32.xlu1 %v261_v3, %s861_s24  ;;  %479 = vrot.lane.b32.xlu0 %v260_v1, %s861_s24  ;;  %p780_p13 = pnand %p779_p12, %p929_p4  ;;  %p787_p3 = por %p786_p2, %p785_p1 }
  0x27   : > { %p781_p0 = pneg %p780_p13 }
  0x29   : > { %535 = vperm.xlu0 %777, %v532_v6   ;;  %p788_p5 = pnand %p787_p3, %p781_p0 }
  0x8b   : > { %v370_v7 = vpop.permute.xlu1 %369  ;;  %v268_v8 = vpop.permute.xlu0 %267 }
  0x8f   : > { %v372_v9 = vpop.permute.xlu1 %371  ;;  %v270_v10 = vpop.permute.xlu0 %269 }
  0x90   : > { %v374_v11 = vsel %vm373_vm3, %v370_v7, %v372_v9  ;;  %v272_v12 = vsel %vm271_vm4, %v268_v8, %v270_v10 }
  0x91   : > { %v279_v13 = vsel %vm277_vm1, %v272_v12, 0  ;;  %v379_v15 = vsel %vm277_vm1, %v374_v11, 0 }
  0x92   : > { %686 = vmatpush3.bf16.msra.mxu0 %v279_v13 }
  0x93   : > { %697 = vmatprep.subr.bf16.mxu0 %v856_v0  ;;  %v427_v16 = vpop.permute.xlu1 %426  ;;  %v425_v17 = vpop.permute.xlu0 %424 }
  0x94   : > { %v429_v18 = vsel %vm428_vm5, %v425_v17, %v427_v16 }
  0x95   : > { %688 = vmatmul.mubr.msk.bf16.vlgmr.msra.gmra.mxu0 %vm273_vm2, %v658_v14  ;;  %v434_v19 = vsel %vm277_vm1, %v429_v18, 0 }
  0x96   : > { %698 = vmatpush3.bf16.msra.mxu0 %v379_v15  ;;  %704 = vmatpush3.bf16.msra.mxu1 %v434_v19 }
  0x97   : > { %v482_v21 = vpop.permute.xlu1 %481  ;;  %v480_v22 = vpop.permute.xlu0 %479  ;;  %699 = vmatprep.mubr.msk.bf16.mxu0 %vm857_vm0, %v856_v0  ;;  %709 = vmatprep.subr.bf16.mxu0 %v856_v0 }
  0x98   : > { %v484_v23 = vsel %vm483_vm6, %v480_v22, %v482_v21 }
  0x99   : > { %706 = vmatmul.mubr.msk.bf16.vlgmr.msra.gmra.mxu1 %vm273_vm2, %v663_v20  ;;  %v489_v25 = vsel %vm277_vm1, %v484_v23, 0 }
  0x9d   : > { %700 = vmatmul.mubr.msk.bf16.vlgmr.msra.gmra.mxu0 %vm273_vm2, %v661_v24 }
  0x9e   : > { %710 = vmatpush3.bf16.msra.mxu0 %v489_v25  ;;  %711 = vmatprep.mubr.msk.bf16.mxu0 %vm857_vm0, %v856_v0 }
  0xa4   : > { %v536_v47 = vpop.permute.xlu0 %535 }
  0xa5   : > { %712 = vmatmul.mubr.msk.bf16.vlgmr.msra.gmra.mxu0 %vm273_vm2, %v665_v26 }
  0xde   : > { %v361_v27 = vpop.f32.mrf.mxu1 }
  0xe0   : > { %v695_v28 = vpop.f32.mrf.mxu1 }
  0xe2   : > { %v364_v29 = vpop.f32.mrf.mxu1 }
  0xe4   : > { %v696_v30 = vpop.f32.mrf.mxu1 }
 0x155   : > { %v315_v31 = vpop.f32.mrf.mxu0 }
 0x156   : > { %v362_v39 = vadd.f32 %v361_v27, %v315_v31 }
 0x157   : > { %v689_v32 = vpop.f32.mrf.mxu0 }
 0x159   : > { %v318_v33 = vpop.f32.mrf.mxu0  ;;  %v470_v34 = vpop.f32.mrf.mxu1 }
 0x15b   : > { %v690_v35 = vpop.f32.mrf.mxu0  ;;  %v707_v36 = vpop.f32.mrf.mxu1 }
 0x15d   : > { %v415_v37 = vpop.f32.mrf.mxu0  ;;  %v473_v38 = vpop.f32.mrf.mxu1 }
 0x15e   : > { %v421_v42 = vadd.f32 %v415_v37, %v362_v39 }
 0x15f   : > { %v701_v40 = vpop.f32.mrf.mxu0  ;;  %v708_v41 = vpop.f32.mrf.mxu1 }
 0x160   : > { %v476_v45 = vadd.f32 %v470_v34, %v421_v42 }
 0x161   : > { %v418_v43 = vpop.f32.mrf.mxu0 }
 0x163   : > { %v702_v44 = vpop.f32.mrf.mxu0 }
 0x165   : > { %v525_v46 = vpop.f32.mrf.mxu0 }
 0x166   : > { %v531_v48 = vadd.f32 %v525_v46, %v476_v45 }
 0x167   : > { %v713_v49 = vpop.f32.mrf.mxu0 }
 0x168   : > { %v538_v50 = vadd.f32 %v536_v47, %v531_v48 }
 0x169   : > { %v528_v51 = vpop.f32.mrf.mxu0 }
 0x16a   : > { %v539_v52 = vmax.f32 %v538_v50, 0.0 }
 0x16b   : > { %v714_v53 = vpop.f32.mrf.mxu0 }
 0x16c   : > { %540 = vst [vmem:[%s240_s21] sm:$0xff] %v539_v52 }
 0x16d   : > { %791 = shalt.err (!%p788_p5)
}
 0x16e   : > { %s792_s8 = scalar_lea.hbm %s1000_s29, 128  ;;  %s796_s11 = scalar_lea.hbm %s1044_s4, 256 }
 0x16f   : > { %p793_p6 = scmp.ne.s32.totalorder %s1000_s29, %s792_s8  ;;  %p797_p10 = scmp.lt.s32.totalorder %s1000_s29, %s1044_s4 }
 0x170   : > { %p798_p11 = scmp.lt.s32.totalorder %s796_s11, %s792_s8 }
 0x171   : > { %p794_p7 = pnand %p793_p6, %p929_p4 }
 0x172   : > { %p799_p12 = por %p798_p11, %p797_p10 }
 0x173   : > { %p795_p9 = pneg %p794_p7 }
 0x175   : > { %p800_p13 = pnand %p799_p12, %p795_p9 }
 0x177   : > { %803 = shalt.err (!%p800_p13)
}
 0x178   : > { %715 = dma.vmem_to_hbm [thread:$0]  (%p929_p4), %s557_s22, 128, %s1000_s29, %s542_s30  }
 0x179 PF: > { %p721_p0 = scmp.ge.s32.totalorder %s854_s20, 2  ;;  %s568_s14 = sand.u32 1, %s834_s15  }
 0x17a   : > { %s569_s21 = scalar_lea.sflag [#allocation3], %s568_s14 }
 0x17b   : > { %p718_p1 = pnand %p721_p0, %p936_p8 }
 0x17d   : > { %p719_p2 = pneg %p718_p1 }
 0x17f   : > { %829 = dma.done.wait (%p719_p2), %s569_s21, 128  }
 0x180   : > { %831 = vsyncadd (%p719_p2), %s569_s21, 4294967168  ;;  %s17_s20 = sadd.s32 1, %s854_s20   ;;  %s1047_s15 = smov %s838_s16 }
 0x181   : > { %p14_p3 = scmp.ge.s32.totalorder %s17_s20, 4   ;;  %s1048_s16 = smov %s842_s17 }
 0x182   : > { %s1049_s17 = smov %s942_s28  ;;  %s1050_s18 = smov %s850_s19 }
 0x183   : > { %s1051_s19 = smov %s1053_s23  ;;  %16 = sbr.rel (!%p14_p3) target bundleno = 4 (0x4), region = 78 }
 0x188   :  { %574 = vsyncpa [#allocation3], 1 }
 0x189   :  { %576 = vsyncpa [#allocation3 + $0x1], 1 }

</bundles_post_ra>
